<compile_context>
chip_gen: v7x
topology: tpu7x:2x2x1
jax: 0.10.0
libtpu: 0.0.40
codegen_flags: <defaults>
</compile_context>

<pallas_src>
import jax
import jax.numpy as jnp
from jax.experimental import pallas as pl
from jax.experimental.pallas import tpu as pltpu


TARGET_BLOCK_BYTES = 6 << 20      # ~6 MiB per data block (in + out dbl-buffered ~24 MiB)
VMEM_LIMIT_BYTES = 40 << 20       # headroom for internal scratch on every generation
MIN_GRID_STEPS = 8                # keep both TCs / the DMA pipeline busy on big tensors


def normalize_kernel(x_ref, p_ref, o_ref):
    # x_ref/o_ref: (TR, TL) tile.  p_ref: (TR, 2) f32 = [mean, 1/std] per row.
    x = x_ref[...].astype(jnp.float32)
    mean = p_ref[:, 0:1]
    scale = p_ref[:, 1:2]
    o_ref[...] = ((x - mean) * scale).astype(o_ref.dtype)


def _shrink(t, base):
    """Largest multiple of `base` that is <= t // 2, or None if below base."""
    h = (t // 2) // base * base
    return h if h >= base else None


def _pick_tiles(R, L, itemsize):
    """Pick (tr, tl): lane tile first (lane-dense stores), then sublane tile.

    Tiles are multiples of (sub_base, 128) unless they cover the full dim
    (full-extent blocks are always legal).  Block bytes stay <= TARGET.
    """
    sub_base = max(8, 32 // itemsize)   # 8 for f32, 16 for bf16, 32 for 8-bit

    # Lane tile: as wide as the byte budget allows at the minimum row count.
    lane_cap = max(128, (TARGET_BLOCK_BYTES // (sub_base * itemsize)) // 128 * 128)
    tl = L if L <= lane_cap else lane_cap

    # Sublane tile: fill the remaining byte budget.
    row_cap = max(sub_base,
                  (TARGET_BLOCK_BYTES // max(1, tl * itemsize)) // sub_base * sub_base)
    tr = R if R <= row_cap else row_cap

    # Keep enough grid steps on large tensors for megacore / pipeline overlap.
    total_bytes = R * L * itemsize
    if total_bytes >= MIN_GRID_STEPS * (1 << 20):
        while pl.cdiv(R, tr) * pl.cdiv(L, tl) < MIN_GRID_STEPS:
            new_tr = _shrink(tr, sub_base)
            new_tl = _shrink(tl, 128)
            if new_tr is not None and pl.cdiv(R, new_tr) > pl.cdiv(R, tr):
                tr = new_tr        # prefer shrinking rows: keeps stores lane-dense
            elif new_tl is not None and pl.cdiv(L, new_tl) > pl.cdiv(L, tl):
                tl = new_tl
            else:
                break
    return tr, tl


def normalize(x, mean, std):
    """(x - mean[None, :, None, None]) / std[None, :, None, None]  (NCHW)."""
    N, C, H, W = x.shape
    R = N * C
    L = H * W
    itemsize = jnp.dtype(x.dtype).itemsize

    # Flatten to a 2-D, lane-dense view: one row per (n, c) plane.
    x2 = x.reshape(R, L)

    # Packed per-row f32 params: [mean[c], 1/std[c]] for row r = n*C + c.
    mean_f32 = jnp.tile(jnp.asarray(mean, dtype=jnp.float32).reshape(C), N)      # (R,)
    scale_f32 = jnp.tile(1.0 / jnp.asarray(std, dtype=jnp.float32).reshape(C), N)  # (R,)
    params = jnp.stack([mean_f32, scale_f32], axis=-1)                            # (R, 2)

    tr, tl = _pick_tiles(R, L, itemsize)
    grid = (pl.cdiv(R, tr), pl.cdiv(L, tl))

    out2 = pl.pallas_call(
        normalize_kernel,
        out_shape=jax.ShapeDtypeStruct((R, L), x.dtype),
        grid=grid,
        in_specs=[
            pl.BlockSpec((tr, tl), lambda i, j: (i, j)),   # x tile
            pl.BlockSpec((tr, 2), lambda i, j: (i, 0)),    # packed [mean, 1/std]
        ],
        out_specs=pl.BlockSpec((tr, tl), lambda i, j: (i, j)),
        compiler_params=pltpu.CompilerParams(
            dimension_semantics=("parallel", "parallel"),
            vmem_limit_bytes=VMEM_LIMIT_BYTES,
        ),
    )(x2, params)

    return out2.reshape(N, C, H, W)


if __name__ == "__main__":
    key = jax.random.PRNGKey(0)
    N, C, H, W = 2, 4, 16, 16
    x = jax.random.normal(key, (N, C, H, W), dtype=jnp.float32)

    # Deterministic per-channel normalization constants (module __init__ args).
    mean = jnp.array([0.485, 0.456, 0.406, 0.5], dtype=jnp.float32)
    std = jnp.array([0.229, 0.224, 0.225, 0.25], dtype=jnp.float32)

    out = normalize(x, mean, std)
    out = jax.block_until_ready(out)

    ref = (x - mean[None, :, None, None]) / std[None, :, None, None]
    assert out.shape == x.shape and out.dtype == x.dtype
    # Kernel multiplies by a precomputed f32 reciprocal (1/std) instead of
    # dividing, so allow ~a few ulp of slack vs the divide-based reference.
    assert jnp.allclose(out, ref, atol=1e-5, rtol=1e-5), "mismatch vs reference"
    print("KERNEL_OK")
</pallas_src>

<mosaic_0001>
module attributes {stable_mosaic.version = 11 : i64} {
  func.func @normalize_kernel(%arg0: i32, %arg1: i32, %arg2: memref<8x256xf32, #tpu.memory_space<vmem>>, %arg3: memref<8x2xf32, #tpu.memory_space<vmem>>, %arg4: memref<8x256xf32, #tpu.memory_space<vmem>>) attributes {dimension_semantics = [#tpu.dimension_semantics<parallel>, #tpu.dimension_semantics<parallel>], iteration_bounds = array<i64: 1, 1>, scalar_prefetch = 0 : i64, scratch_operands = 0 : i64, tpu.core_type = #tpu.core_type<tc>, window_params = [{transform_indices = @transform_0, window_bounds = array<i64: 8, 256>}, {transform_indices = @transform_1, window_bounds = array<i64: 8, 2>}, {transform_indices = @transform_2, window_bounds = array<i64: 8, 256>}]} {
    %c0 = arith.constant 0 : index
    %c0_0 = arith.constant 0 : index
    %0 = vector.load %arg2[%c0, %c0_0] : memref<8x256xf32, #tpu.memory_space<vmem>>, vector<8x256xf32>
    %c0_1 = arith.constant 0 : index
    %c0_2 = arith.constant 0 : index
    %1 = vector.load %arg3[%c0_1, %c0_2] : memref<8x2xf32, #tpu.memory_space<vmem>>, vector<8x1xf32>
    %c0_3 = arith.constant 0 : index
    %c1 = arith.constant 1 : index
    %2 = vector.load %arg3[%c0_3, %c1] : memref<8x2xf32, #tpu.memory_space<vmem>>, vector<8x1xf32>
    %3 = vector.broadcast %1 : vector<8x1xf32> to vector<8x256xf32>
    %4 = arith.subf %0, %3 : vector<8x256xf32>
    %5 = vector.broadcast %2 : vector<8x1xf32> to vector<8x256xf32>
    %6 = arith.mulf %4, %5 : vector<8x256xf32>
    %c0_4 = arith.constant 0 : index
    %c0_5 = arith.constant 0 : index
    %7 = vector.load %arg4[%c0_4, %c0_5] : memref<8x256xf32, #tpu.memory_space<vmem>>, vector<8x256xf32>
    tpu.vector_store %arg4[%c0_4, %c0_5], %6 {strides = array<i32>} : memref<8x256xf32, #tpu.memory_space<vmem>>, vector<8x256xf32>,
    return
  }
  func.func @transform_0(%arg0: i32, %arg1: i32) -> (i32, i32) {
    %c0_i32 = arith.constant 0 : i32
    return %arg0, %arg1 : i32, i32
  }
  func.func @transform_1(%arg0: i32, %arg1: i32) -> (i32, i32) {
    %c0_i32 = arith.constant 0 : i32
    %c0_i32_0 = arith.constant 0 : i32
    return %arg0, %c0_i32 : i32, i32
  }
  func.func @transform_2(%arg0: i32, %arg1: i32) -> (i32, i32) {
    %c0_i32 = arith.constant 0 : i32
    return %arg0, %arg1 : i32, i32
  }
}

</mosaic_0001>

<bundles_post_ra>
// kernel: tpu_custom_call.1
= control target key start
LH: loop header
LB: loop body
LE: loop exit
PB: predicated region body
PF: predicated region fallthrough
CT: control target
= control target key end

     0   :  { %7 = vsyncpa [#allocation3], 0  ;;  %s157_s0 = inlined_call_operand.hbm [shape: f32[8,256], index: 0, kind: input, shape index: {}]   ;;  %s158_s1 = inlined_call_operand.vmem [shape: f32[8,2], index: 1, kind: input, shape index: {}]   ;;  %s159_s2 = inlined_call_operand.hbm [shape: f32[8,256], index: 2, kind: output, shape index: {}]  }
   0x1   :  { %8 = vsyncpa [#allocation4], 0  ;;  %s111_s9 = smov [#allocation2]   ;;  %s63_s13 = scalar_lea.hbm %s157_s0, 256 }
   0x2   :  { %s15_s10 = sshll.u32 %s111_s9, 4  ;;  %p64_p0 = scmp.ne.s32.totalorder %s157_s0, %s63_s13  ;;  %s16_s10 = int_to_ptr.vmem [resolvable:$true] %s15_s10 }
   0x3   :  { %p67_p1 = scmp.lt.u32.totalorder %s63_s13, %s157_s0 }
   0x5   :  { %p69_p2 = pnand %p67_p1, %p64_p0 }
   0x7   :  { %72 = shalt.err (!%p69_p2)
}
   0x8   :  { %s73_s18 = scalar_lea.vmem %s16_s10, 256  ;;  %p78_p4 = scmp.lt.s32.totalorder %s16_s10, %s16_s10 }
   0x9   :  { %p74_p3 = scmp.ne.s32.totalorder %s16_s10, %s73_s18  ;;  %p79_p5 = scmp.lt.s32.totalorder %s73_s18, %s73_s18 }
   0xb   :  { %p80_p6 = por %p79_p5, %p78_p4 }
   0xd   :  { %p81_p7 = pnand %p80_p6, %p74_p3 }
   0xf   :  { %84 = shalt.err (!%p81_p7)
}
  0x10   :  { %18 = dma.hbm_to_vmem [thread:$0]  %s157_s0, 256, %s16_s10, [#allocation3]  }
  0x11   :  { %107 = dma.done.wait [#allocation3], 256  }
  0x12   :  { %108 = vsyncadd [#allocation3], 4294967040  ;;  %v112_v0 = vmov 0   ;;  %v26_v1 = vld [vmem:[%s158_s1] sm:$0xff]  ;;  %v113_v2 = vmov 1   ;;  %v25_v5 = vld [vmem:[#allocation2 + $0x8] sm:$0xff] }
  0x13   :  { %61 = vset.pattern.permute.xlu0 %v112_v0  ;;  %v24_v4 = vld [vmem:[#allocation2] sm:$0xff]  ;;  %s114_s23 = smov [#allocation5]  }
  0x14   :  { %29 = vperm.xlu0 %61, %v26_v1   ;;  %s48_s24 = sshll.u32 %s114_s23, 4  ;;  %s49_s24 = int_to_ptr.vmem [resolvable:$true] %s48_s24 }
  0x15   :  { %s85_s0 = scalar_lea.vmem %s49_s24, 256  ;;  %p90_p9 = scmp.lt.s32.totalorder %s49_s24, %s49_s24 }
  0x16   :  { %p86_p8 = scmp.ne.s32.totalorder %s49_s24, %s85_s0  ;;  %p91_p10 = scmp.lt.s32.totalorder %s85_s0, %s85_s0 }
  0x18   :  { %62 = vset.pattern.permute.xlu0 %v113_v2  ;;  %p92_p11 = por %p91_p10, %p90_p9 }
  0x19   :  { %35 = vperm.xlu0 %62, %v26_v1  }
  0x1a   :  { %p93_p12 = pnand %p92_p11, %p86_p8 }
  0x93   :  { %v30_v3 = vpop.permute.xlu0 %29 }
  0x94   :  { %v32_v6 = vsub.f32 %v24_v4, %v30_v3  ;;  %v33_v7 = vsub.f32 %v25_v5, %v30_v3 }
  0x98   :  { %v36_v8 = vpop.permute.xlu0 %35 }
  0x99   :  { %v38_v9 = vmul.f32 %v36_v8, %v32_v6  ;;  %v39_v10 = vmul.f32 %v36_v8, %v33_v7 }
  0x9b   :  { %40 = vst [vmem:[#allocation5] sm:$0xff] %v38_v9  ;;  %41 = vst [vmem:[#allocation5 + $0x8] sm:$0xff] %v39_v10 }
  0x9c   :  { %96 = shalt.err (!%p93_p12)
}
  0x9d   :  { %s97_s26 = scalar_lea.hbm %s159_s2, 256 }
  0x9e   :  { %p98_p13 = scmp.ne.s32.totalorder %s159_s2, %s97_s26  ;;  %p101_p0 = scmp.lt.u32.totalorder %s97_s26, %s159_s2 }
  0xa0   :  { %p103_p1 = pnand %p101_p0, %p98_p13 }
  0xa2   :  { %106 = shalt.err (!%p103_p1)
}
  0xa3   :  { %51 = dma.vmem_to_hbm [thread:$0]  %s49_s24, 256, %s159_s2, [#allocation4]  }
  0xa4   :  { %109 = dma.done.wait [#allocation4], 256  }
  0xa5   :  { %110 = vsyncadd [#allocation4], 4294967040 }
  0xa6   :  { %55 = vsyncpa [#allocation3], 1 }
  0xa7   :  { %56 = vsyncpa [#allocation4], 1 }

</bundles_post_ra>
